<compile_context>
chip_gen: v6e
topology: v6e:2x2x1
jax: 0.10.0
libtpu: 0.0.40
codegen_flags: <defaults>
</compile_context>

<pallas_src>
import functools

import jax
import jax.numpy as jnp
from jax.experimental import pallas as pl
from jax.experimental.pallas import tpu as pltpu


def _apply_act(h, act):
    if act == "relu":
        return jnp.maximum(h, 0.0)
    if act == "tanh":
        return jnp.tanh(h)
    if act in ("identity", "none", None):
        return h
    raise ValueError(f"unknown activation {act!r}")


def _fused_mlp_kernel(*refs, n_layers, hidden_act, out_act):
    """One batch tile through the whole MLP.

    refs = (x_ref, w1_ref, b1_ref, ..., wN_ref, bN_ref, o_ref)
    Intermediates stay in registers / VMEM; only o_ref hits HBM.
    """
    x_ref = refs[0]
    o_ref = refs[-1]
    wb = refs[1:-1]

    h = x_ref[...].astype(jnp.float32)
    for i in range(n_layers):                       # unrolled at trace time
        w = wb[2 * i][...]
        b = wb[2 * i + 1][...].astype(jnp.float32)  # (1, dout), loaded once
        # MXU matmul, f32 accumulation (bf16 inputs hit the bf16 MXU path).
        h = jnp.dot(h.astype(w.dtype), w, preferred_element_type=jnp.float32)
        h = h + b                                   # f32 epilogue (v5e-safe)
        act = out_act if i == n_layers - 1 else hidden_act
        h = _apply_act(h, act)
    o_ref[...] = h.astype(o_ref.dtype)


def mlp_forward(x, params, hidden_act="relu", out_act="tanh", *, batch_tile=256):
    """Fused MLP forward.  x: [B, in_dim], params: [(w_i [din,dout], b_i [dout])]."""
    B, Din = x.shape
    n_layers = len(params)
    Dout = params[-1][0].shape[1]
    out_dtype = x.dtype

    # ---- batch tiling ------------------------------------------------------
    if B <= batch_tile:
        TB, B_pad = B, B                     # single block == full array dims
    else:
        TB = batch_tile                      # multiple of 8 -> valid sublanes
        B_pad = int(pl.cdiv(B, TB)) * TB
    x_in = x if B_pad == B else jnp.pad(x, ((0, B_pad - B), (0, 0)))
    grid = (B_pad // TB,)

    # ---- operands & BlockSpecs --------------------------------------------
    flat_inputs = [x_in]
    in_specs = [pl.BlockSpec((TB, Din), lambda i: (i, 0))]
    for w, b in params:
        din, dout = w.shape
        flat_inputs.append(w)
        in_specs.append(pl.BlockSpec((din, dout), lambda i: (0, 0)))   # resident
        flat_inputs.append(b.reshape(1, dout))
        in_specs.append(pl.BlockSpec((1, dout), lambda i: (0, 0)))     # resident
    out_specs = pl.BlockSpec((TB, Dout), lambda i: (i, 0))

    # ---- explicit VMEM budget (double-buffered inputs + f32 intermediates) --
    in_bytes = sum(int(a.size) * a.dtype.itemsize for a in flat_inputs)
    max_width = max([Din, Dout] + [w.shape[1] for w, _ in params])
    inter_bytes = TB * max_width * 4 * 2
    out_bytes = TB * Dout * jnp.dtype(out_dtype).itemsize
    vmem_limit = 2 * (in_bytes + out_bytes) + inter_bytes + (4 << 20)
    vmem_limit = int(min(max(vmem_limit, 16 << 20), 64 << 20))
    # TODO(synk): for very large hidden dims (weights > ~VMEM/4) add K/N weight
    # tiling with an f32 accumulator scratch instead of whole-weight blocks.

    kernel = functools.partial(
        _fused_mlp_kernel,
        n_layers=n_layers,
        hidden_act=hidden_act,
        out_act=out_act,
    )
    y = pl.pallas_call(
        kernel,
        out_shape=jax.ShapeDtypeStruct((B_pad, Dout), out_dtype),
        grid=grid,
        in_specs=in_specs,
        out_specs=out_specs,
        compiler_params=pltpu.CompilerParams(
            dimension_semantics=("parallel",),   # shards batch tiles across v7x TCs
            vmem_limit_bytes=vmem_limit,
        ),
    )(*flat_inputs)
    return y[:B] if B_pad != B else y


class MlpPallas:
    """Simple MLP backbone: (Linear + hidden_act)* + Linear + out_act."""

    def __init__(self, in_dim, hidden_dims, out_dim, key,
                 hidden_act="relu", out_act="tanh", param_dtype=jnp.float32):
        self.hidden_act = hidden_act
        self.out_act = out_act
        self.params = []
        dims = [in_dim] + list(hidden_dims) + [out_dim]
        keys = jax.random.split(key, len(dims) - 1)
        for k, (din, dout) in zip(keys, zip(dims[:-1], dims[1:])):
            kw, kb = jax.random.split(k)
            # PyTorch nn.Linear default init: U(-1/sqrt(fan_in), 1/sqrt(fan_in))
            bound = 1.0 / (din ** 0.5)
            w = jax.random.uniform(kw, (din, dout), jnp.float32, -bound, bound)
            b = jax.random.uniform(kb, (dout,), jnp.float32, -bound, bound)
            self.params.append((w.astype(param_dtype), b.astype(param_dtype)))

    def __call__(self, x):
        return mlp_forward(x, self.params, self.hidden_act, self.out_act)


def _mlp_reference(x, params, hidden_act, out_act):
    """Plain-JAX reference for correctness checking."""
    n = len(params)
    for i, (w, b) in enumerate(params):
        x = x @ w.astype(jnp.float32) + b.astype(jnp.float32)
        act = out_act if i == n - 1 else hidden_act
        x = _apply_act(x, act)
    return x


if __name__ == "__main__":
    key = jax.random.PRNGKey(0)
    k_x, k_x2, k_p = jax.random.split(key, 3)

    batch, in_dim, out_dim = 2, 16, 8
    hidden_dims = (32, 32)

    mlp = MlpPallas(in_dim, hidden_dims, out_dim, key=k_p,
                    hidden_act="relu", out_act="tanh")

    # --- small batch (single block) -----------------------------------------
    x = jax.random.normal(k_x, (batch, in_dim), jnp.float32)
    y = jax.block_until_ready(mlp(x))
    y_ref = _mlp_reference(x, mlp.params, "relu", "tanh")
    assert y.shape == (batch, out_dim), y.shape
    assert jnp.allclose(y, y_ref, atol=1e-4, rtol=1e-4), "mismatch (small batch)"

    # --- larger batch (exercises batch tiling + padding path) ---------------
    x2 = jax.random.normal(k_x2, (300, in_dim), jnp.float32)
    y2 = jax.block_until_ready(mlp(x2))
    y2_ref = _mlp_reference(x2, mlp.params, "relu", "tanh")
    assert y2.shape == (300, out_dim), y2.shape
    assert jnp.allclose(y2, y2_ref, atol=1e-4, rtol=1e-4), "mismatch (tiled batch)"

    print("KERNEL_OK")
</pallas_src>

<mosaic_0001>
module attributes {stable_mosaic.version = 11 : i64} {
  func.func @_fused_mlp_kernel(%arg0: i32, %arg1: memref<2x16xf32, #tpu.memory_space<vmem>>, %arg2: memref<16x32xf32, #tpu.memory_space<vmem>>, %arg3: memref<1x32xf32, #tpu.memory_space<vmem>>, %arg4: memref<32x32xf32, #tpu.memory_space<vmem>>, %arg5: memref<1x32xf32, #tpu.memory_space<vmem>>, %arg6: memref<32x8xf32, #tpu.memory_space<vmem>>, %arg7: memref<1x8xf32, #tpu.memory_space<vmem>>, %arg8: memref<2x8xf32, #tpu.memory_space<vmem>>) attributes {dimension_semantics = [#tpu.dimension_semantics<parallel>], iteration_bounds = array<i64: 1>, scalar_prefetch = 0 : i64, scratch_operands = 0 : i64, tpu.core_type = #tpu.core_type<tc>, window_params = [{transform_indices = @transform_0, window_bounds = array<i64: 2, 16>}, {pipeline_mode = #tpu.pipeline_mode<synchronous>, transform_indices = @transform_1, window_bounds = array<i64: 16, 32>}, {pipeline_mode = #tpu.pipeline_mode<synchronous>, transform_indices = @transform_2, window_bounds = array<i64: 1, 32>}, {pipeline_mode = #tpu.pipeline_mode<synchronous>, transform_indices = @transform_3, window_bounds = array<i64: 32, 32>}, {pipeline_mode = #tpu.pipeline_mode<synchronous>, transform_indices = @transform_4, window_bounds = array<i64: 1, 32>}, {pipeline_mode = #tpu.pipeline_mode<synchronous>, transform_indices = @transform_5, window_bounds = array<i64: 32, 8>}, {pipeline_mode = #tpu.pipeline_mode<synchronous>, transform_indices = @transform_6, window_bounds = array<i64: 1, 8>}, {transform_indices = @transform_7, window_bounds = array<i64: 2, 8>}]} {
    %c0 = arith.constant 0 : index
    %c0_0 = arith.constant 0 : index
    %0 = vector.load %arg1[%c0, %c0_0] : memref<2x16xf32, #tpu.memory_space<vmem>>, vector<2x16xf32>
    %c0_1 = arith.constant 0 : index
    %c0_2 = arith.constant 0 : index
    %1 = vector.load %arg2[%c0_1, %c0_2] : memref<16x32xf32, #tpu.memory_space<vmem>>, vector<16x32xf32>
    %c0_3 = arith.constant 0 : index
    %c0_4 = arith.constant 0 : index
    %2 = vector.load %arg3[%c0_3, %c0_4] : memref<1x32xf32, #tpu.memory_space<vmem>>, vector<1x32xf32>
    %cst = arith.constant dense<0.000000e+00> : vector<2x32xf32>
    %3 = tpu.matmul %0, %1, %cst {dimension_numbers = #tpu.dot_dimension_numbers<[1], [0], [0], [1], [0, 0, 1, 1], [], []>} : vector<2x16xf32>, vector<16x32xf32>, vector<2x32xf32> -> vector<2x32xf32>
    %4 = vector.broadcast %2 : vector<1x32xf32> to vector<2x32xf32>
    %5 = arith.addf %3, %4 : vector<2x32xf32>
    %cst_5 = arith.constant 0.000000e+00 : f32
    %6 = vector.broadcast %cst_5 : f32 to vector<2x32xf32>
    %7 = arith.maximumf %5, %6 : vector<2x32xf32>
    %c0_6 = arith.constant 0 : index
    %c0_7 = arith.constant 0 : index
    %8 = vector.load %arg4[%c0_6, %c0_7] : memref<32x32xf32, #tpu.memory_space<vmem>>, vector<32x32xf32>
    %c0_8 = arith.constant 0 : index
    %c0_9 = arith.constant 0 : index
    %9 = vector.load %arg5[%c0_8, %c0_9] : memref<1x32xf32, #tpu.memory_space<vmem>>, vector<1x32xf32>
    %cst_10 = arith.constant dense<0.000000e+00> : vector<2x32xf32>
    %10 = tpu.matmul %7, %8, %cst_10 {dimension_numbers = #tpu.dot_dimension_numbers<[1], [0], [0], [1], [0, 0, 1, 1], [], []>} : vector<2x32xf32>, vector<32x32xf32>, vector<2x32xf32> -> vector<2x32xf32>
    %11 = vector.broadcast %9 : vector<1x32xf32> to vector<2x32xf32>
    %12 = arith.addf %10, %11 : vector<2x32xf32>
    %cst_11 = arith.constant 0.000000e+00 : f32
    %13 = vector.broadcast %cst_11 : f32 to vector<2x32xf32>
    %14 = arith.maximumf %12, %13 : vector<2x32xf32>
    %c0_12 = arith.constant 0 : index
    %c0_13 = arith.constant 0 : index
    %15 = vector.load %arg6[%c0_12, %c0_13] : memref<32x8xf32, #tpu.memory_space<vmem>>, vector<32x8xf32>
    %c0_14 = arith.constant 0 : index
    %c0_15 = arith.constant 0 : index
    %16 = vector.load %arg7[%c0_14, %c0_15] : memref<1x8xf32, #tpu.memory_space<vmem>>, vector<1x8xf32>
    %cst_16 = arith.constant dense<0.000000e+00> : vector<2x8xf32>
    %17 = tpu.matmul %14, %15, %cst_16 {dimension_numbers = #tpu.dot_dimension_numbers<[1], [0], [0], [1], [0, 0, 1, 1], [], []>} : vector<2x32xf32>, vector<32x8xf32>, vector<2x8xf32> -> vector<2x8xf32>
    %18 = vector.broadcast %16 : vector<1x8xf32> to vector<2x8xf32>
    %19 = arith.addf %17, %18 : vector<2x8xf32>
    %20 = math.tanh %19 : vector<2x8xf32>
    %c0_17 = arith.constant 0 : index
    %c0_18 = arith.constant 0 : index
    %21 = vector.load %arg8[%c0_17, %c0_18] : memref<2x8xf32, #tpu.memory_space<vmem>>, vector<2x8xf32>
    tpu.vector_store %arg8[%c0_17, %c0_18], %20 {strides = array<i32>} : memref<2x8xf32, #tpu.memory_space<vmem>>, vector<2x8xf32>,
    return
  }
  func.func @transform_0(%arg0: i32) -> (i32, i32) {
    %c0_i32 = arith.constant 0 : i32
    %c0_i32_0 = arith.constant 0 : i32
    return %arg0, %c0_i32 : i32, i32
  }
  func.func @transform_1(%arg0: i32) -> (i32, i32) {
    %c0_i32 = arith.constant 0 : i32
    %c0_i32_0 = arith.constant 0 : i32
    %c0_i32_1 = arith.constant 0 : i32
    return %c0_i32, %c0_i32_0 : i32, i32
  }
  func.func @transform_2(%arg0: i32) -> (i32, i32) {
    %c0_i32 = arith.constant 0 : i32
    %c0_i32_0 = arith.constant 0 : i32
    %c0_i32_1 = arith.constant 0 : i32
    return %c0_i32, %c0_i32_0 : i32, i32
  }
  func.func @transform_3(%arg0: i32) -> (i32, i32) {
    %c0_i32 = arith.constant 0 : i32
    %c0_i32_0 = arith.constant 0 : i32
    %c0_i32_1 = arith.constant 0 : i32
    return %c0_i32, %c0_i32_0 : i32, i32
  }
  func.func @transform_4(%arg0: i32) -> (i32, i32) {
    %c0_i32 = arith.constant 0 : i32
    %c0_i32_0 = arith.constant 0 : i32
    %c0_i32_1 = arith.constant 0 : i32
    return %c0_i32, %c0_i32_0 : i32, i32
  }
  func.func @transform_5(%arg0: i32) -> (i32, i32) {
    %c0_i32 = arith.constant 0 : i32
    %c0_i32_0 = arith.constant 0 : i32
    %c0_i32_1 = arith.constant 0 : i32
    return %c0_i32, %c0_i32_0 : i32, i32
  }
  func.func @transform_6(%arg0: i32) -> (i32, i32) {
    %c0_i32 = arith.constant 0 : i32
    %c0_i32_0 = arith.constant 0 : i32
    %c0_i32_1 = arith.constant 0 : i32
    return %c0_i32, %c0_i32_0 : i32, i32
  }
  func.func @transform_7(%arg0: i32) -> (i32, i32) {
    %c0_i32 = arith.constant 0 : i32
    %c0_i32_0 = arith.constant 0 : i32
    return %arg0, %c0_i32 : i32, i32
  }
}

</mosaic_0001>

<bundles_post_ra>
// kernel: tpu_custom_call.1
= control target key start
LH: loop header
LB: loop body
LE: loop exit
PB: predicated region body
PF: predicated region fallthrough
CT: control target
= control target key end

     0   :  { %12 = vsyncpa [#allocation3], 0  ;;  %s507_s0 = inlined_call_operand.vmem [shape: f32[2,16], index: 0, kind: input, shape index: {}]   ;;  %s508_s1 = inlined_call_operand.hbm [shape: f32[16,32], index: 1, kind: input, shape index: {}]   ;;  %s509_s2 = inlined_call_operand.vmem [shape: f32[1,32], index: 2, kind: input, shape index: {}]   ;;  %s510_s3 = inlined_call_operand.vmem [shape: f32[32,32], index: 3, kind: input, shape index: {}]   ;;  %s511_s4 = inlined_call_operand.vmem [shape: f32[1,32], index: 4, kind: input, shape index: {}]   ;;  %s512_s5 = inlined_call_operand.vmem [shape: f32[32,8], index: 5, kind: input, shape index: {}]   ;;  %s513_s6 = inlined_call_operand.vmem [shape: f32[1,8], index: 6, kind: input, shape index: {}]   ;;  %s514_s7 = inlined_call_operand.hbm [shape: f32[2,8], index: 7, kind: output, shape index: {}]  }
   0x1   :  { %13 = vsyncpa [#allocation4], 0  ;;  %s414_s24 = smov [#allocation2]  }
   0x2   :  { %s21_s25 = sshll.u32 %s414_s24, 4  ;;  %s22_s25 = int_to_ptr.vmem [resolvable:$true] %s21_s25 }
   0x3   :  { %s378_s26 = scalar_lea.vmem %s22_s25, 256  ;;  %p383_p1 = scmp.lt.s32.totalorder %s22_s25, %s22_s25 }
   0x4   :  { %p379_p0 = scmp.ne.s32.totalorder %s22_s25, %s378_s26  ;;  %p384_p2 = scmp.lt.s32.totalorder %s378_s26, %s378_s26 }
   0x6   :  { %p385_p3 = por %p384_p2, %p383_p1 }
   0x8   :  { %p386_p4 = pnand %p385_p3, %p379_p0 }
   0xa   :  { %389 = shalt.err (!%p386_p4)
}
   0xb   :  { %s415_s27 = smov 128   ;;  %s416_s28 = smov 8  }
   0xc   :  { %27 = dma.hbm_to_vmem [thread:$0]  %s508_s1, 256, %s22_s25, [#allocation3], %s415_s27, %s415_s27, %s416_s28  }
   0xd   :  { %410 = dma.done.wait [#allocation3], 256  }
   0xe   :  { %411 = vsyncadd [#allocation3], 4294967040  ;;  %v417_v0 = vmov 0.0   ;;  %vm418_vm0 = vmmov 0   ;;  %v43_v1 = vld [vmem:[#allocation2 + $0x8] sm:$0xff]  ;;  %v42_v2 = vld [vmem:[#allocation2] sm:$0xff] }
   0xf   :  { %333 = vmatprep.subr.mxu0 %v417_v0  ;;  %337 = vmatprep.mubr.msk.f32.mxu0 %vm418_vm0, %v417_v0  ;;  %v41_v3 = vld [vmem:[%s507_s0] sm:$0x3]  ;;  %vm51_vm1 = vcmask 130048   ;;  %v129_v4 = vld [vmem:[%s510_s3 + $0x18] sm:$0xff]  ;;  %v128_v5 = vld [vmem:[%s510_s3 + $0x10] sm:$0xff]  ;;  %vm137_vm2 = vcmask 261120  }
  0x10   :  { %340 = vmatprep.subr.mxu1 %v417_v0  ;;  %348 = vmatprep.mubr.msk.f32.mxu1 %vm418_vm0, %v417_v0  ;;  %v127_v6 = vld [vmem:[%s510_s3 + $0x8] sm:$0xff]  ;;  %v126_v7 = vld [vmem:[%s510_s3] sm:$0xff]  ;;  %v215_v8 = vld [vmem:[%s512_s5 + $0x18] sm:$0xff]  ;;  %vm297_vm3 = vcmask 58368  }
  0x11   :  { %334 = vmatpush3.msra.mxu0 %v43_v1  ;;  %341 = vmatpush3.msra.mxu1 %v129_v4  ;;  %v314_v9 = vld [vmem:[%s509_s2] ss:$0 sm:$0xff]  ;;  %v214_v14 = vld [vmem:[%s512_s5 + $0x10] sm:$0xff]  ;;  %v213_v15 = vld [vmem:[%s512_s5 + $0x8] sm:$0xff] }
  0x12   :  { %335 = vmatprep.subr.mxu0 %v417_v0  ;;  %342 = vmatprep.subr.mxu1 %v417_v0  ;;  %v212_v16 = vld [vmem:[%s512_s5] sm:$0xff]  ;;  %s419_s5 = smov [#allocation5]  }
  0x13   :  { %336 = vmatpush3.msra.mxu0 %v42_v2  ;;  %343 = vmatpush3.msra.mxu1 %v128_v5  ;;  %v316_v17 = vld [vmem:[%s511_s4] ss:$0 sm:$0xff]  ;;  %s305_s28 = sshll.u32 %s419_s5, 4  ;;  %s306_s28 = int_to_ptr.vmem [resolvable:$true] %s305_s28 }
  0x14   :  { %338 = vmatmul.mubr.msk.f32.vlgmr.msra.gmra.mxu0 %vm51_vm1, %v41_v3  ;;  %351 = vmatprep.subr.mxu0 %v417_v0  ;;  %v318_v22 = vld [vmem:[%s513_s6] ss:$0 sm:$0xff]  ;;  %s390_s4 = scalar_lea.vmem %s306_s28, 32  ;;  %p395_p6 = scmp.lt.s32.totalorder %s306_s28, %s306_s28 }
  0x15   :  { %359 = vmatprep.mubr.msk.f32.mxu0 %vm418_vm0, %v417_v0  ;;  %344 = vmatprep.subr.mxu1 %v417_v0  ;;  %p391_p5 = scmp.ne.s32.totalorder %s306_s28, %s390_s4  ;;  %p396_p7 = scmp.lt.s32.totalorder %s390_s4, %s390_s4 }
  0x16   :  { %345 = vmatpush3.msra.mxu1 %v127_v6  ;;  %352 = vmatpush3.msra.mxu0 %v215_v8 }
  0x17   :  { %346 = vmatprep.subr.mxu1 %v417_v0  ;;  %353 = vmatprep.subr.mxu0 %v417_v0  ;;  %p397_p8 = por %p396_p7, %p395_p6 }
  0x18   :  { %347 = vmatpush3.msra.mxu1 %v126_v7  ;;  %354 = vmatpush3.msra.mxu0 %v214_v14 }
  0x19   :  { %355 = vmatprep.subr.mxu0 %v417_v0  ;;  %p398_p9 = pnand %p397_p8, %p391_p5 }
  0x1a   :  { %356 = vmatpush3.msra.mxu0 %v213_v15 }
  0x1b   :  { %357 = vmatprep.subr.mxu0 %v417_v0 }
  0x1c   :  { %358 = vmatpush3.msra.mxu0 %v212_v16 }
  0xd4   :  { %v121_v10 = vpop.f32.mrf.mxu0 }
  0xd5   :  { %v122_v11 = vadd.f32 %v314_v9, %v121_v10 }
  0xd6   :  { %v339_v12 = vpop.f32.mrf.mxu0 }
  0xd7   :  { %v125_v13 = vmax.f32 %v122_v11, 0.0 }
  0xd9   :  { %349 = vmatmul.mubr.msk.f32.vlgmr.msra.gmra.mxu1 %vm137_vm2, %v125_v13 }
 0x199   :  { %v207_v18 = vpop.f32.mrf.mxu1 }
 0x19a   :  { %v208_v19 = vadd.f32 %v316_v17, %v207_v18 }
 0x19b   :  { %v350_v20 = vpop.f32.mrf.mxu1 }
 0x19c   :  { %v211_v21 = vmax.f32 %v208_v19, 0.0 }
 0x19e   :  { %360 = vmatmul.mubr.msk.f32.vlgmr.msra.gmra.mxu0 %vm137_vm2, %v211_v21 }
 0x25e   :  { %v292_v23 = vpop.f32.mrf.mxu0 }
 0x25f   :  { %v293_v24 = vadd.f32 %v318_v22, %v292_v23 }
 0x260   :  { %v361_v25 = vpop.f32.mrf.mxu0 }
 0x261   :  { %368 = vtanh.f32 %v293_v24 }
 0x26e   :  { %v369_v26 = vpop.eup %368 }
 0x26f   :  { %298 = vst.msk [vmem:[#allocation5] sm:$0x3] %vm297_vm3, %v369_v26 }
 0x270   :  { %401 = shalt.err (!%p398_p9)
}
 0x271   :  { %308 = dma.vmem_to_hbm [thread:$0]  %s306_s28, 32, %s514_s7, [#allocation4]  }
 0x272   :  { %412 = dma.done.wait [#allocation4], 32  }
 0x273   :  { %413 = vsyncadd [#allocation4], 4294967264 }
 0x274   :  { %312 = vsyncpa [#allocation3], 1 }
 0x275   :  { %313 = vsyncpa [#allocation4], 1 }

</bundles_post_ra>
